<compile_context>
chip_gen: v5e
topology: v5e:2x2
jax: 0.10.0
libtpu: 0.0.40
codegen_flags: <defaults>
</compile_context>

<pallas_src>
import numpy as np
import jax
import jax.numpy as jnp
from jax.experimental import pallas as pl
from jax.experimental.pallas import tpu as pltpu

# ----- problem sizes (small, consistent with the module's forward) --------------
B, C, H, W_IMG = 2, 4, 16, 16          # batch, args.image_channels, args.img_size
S = H * W_IMG                          # flattened spatial
K = 10                                 # args.class_count
NUM = 4                                # args.num (number of random probes)
SIGMA = 0.1                            # args.sigma
LABEL = 0                              # hinge_func(..., class_count, 0)
SQRT_S = float(np.sqrt(S))             # sqrt(H*W)


def _norm_img(x):
    # TODO(synk): `norm` is undefined in the reference file; assume clamp to [0, 1].
    return jnp.clip(x, 0.0, 1.0)


def parallel_noise_kernel(imgs_ref, noise_ref, rand_ref, w_ref, b_ref, out_ref):
    """One grid step = one batch element (batch dim is squeezed out of the refs).

    imgs_ref/noise_ref/out_ref: (C, S); rand_ref: (NUM, C, S);
    w_ref: (C, S, K); b_ref: (1, K).
    """
    base = imgs_ref[...] + noise_ref[...]                         # (C, S)
    base_n = _norm_img(base)                                      # norm(imgs + noise)

    # try_noise for all NUM probes at once: uniform[0,1)-0.5, L2-normalized over
    # the spatial dims per channel, scaled by sqrt(H*W)*sigma.  rsqrt -> EUP.
    tmp = rand_ref[...] - 0.5                                     # (NUM, C, S)
    sumsq = jnp.sum(tmp * tmp, axis=-1, keepdims=True)            # (NUM, C, 1)
    tmp = tmp * (jax.lax.rsqrt(sumsq) * (SQRT_S * SIGMA))

    pert = _norm_img(base[None] + tmp)                            # (NUM, C, S)

    # Batch base + all probe images into the M dimension of the d_net matmul.
    x_all = jnp.concatenate([base_n[None], pert], axis=0)         # (1+NUM, C, S)

    # d_net: flatten + linear, realized as per-channel MXU matmuls so no
    # lane-merging reshape is needed.
    acc = jnp.dot(x_all[:, 0, :], w_ref[0],
                  preferred_element_type=jnp.float32)             # (1+NUM, K)
    for c in range(1, C):
        acc = acc + jnp.dot(x_all[:, c, :], w_ref[c],
                            preferred_element_type=jnp.float32)
    logits = acc + b_ref[...]                                     # (1+NUM, K)

    # TODO(synk): hinge_func is undefined upstream; assume
    # logits[:, label] - max_{k != label} logits[:, k], with static label == 0.
    hinge = logits[:, 0:1] - jnp.max(logits[:, 1:], axis=-1, keepdims=True)

    # c_j = fx - added_j  (fx = hinge of the base image, rows 1.. are the probes)
    cvals = hinge[0:1] - hinge[1:]                                # (NUM, 1)

    wd = jnp.sum(tmp * cvals[:, :, None], axis=0)                 # (C, S)
    nc = jnp.sum(cvals * cvals, axis=0, keepdims=True)            # (1, 1)

    # weighted_direction / (sqrt(norm_c) + 1e-20) / sigma  via EUP reciprocal.
    scale = pl.reciprocal(jnp.sqrt(nc) + 1e-20, approx=True) * (1.0 / SIGMA)
    out_ref[...] = wd * scale                                     # (C, S)


def parallel_noise(imgs, noise, rand, w, b):
    """imgs/noise: (B,C,H,W) f32; rand: (NUM,B,C,S) uniform[0,1); w: (C,S,K); b: (1,K)."""
    imgs3 = imgs.reshape(B, C, S)
    noise3 = noise.reshape(B, C, S)
    out = pl.pallas_call(
        parallel_noise_kernel,
        out_shape=jax.ShapeDtypeStruct((B, C, S), jnp.float32),
        grid=(B,),
        in_specs=[
            pl.BlockSpec((None, C, S), lambda bb: (bb, 0, 0)),        # imgs[b]
            pl.BlockSpec((None, C, S), lambda bb: (bb, 0, 0)),        # noise[b]
            pl.BlockSpec((NUM, None, C, S), lambda bb: (0, bb, 0, 0)),  # rand[:, b]
            pl.BlockSpec((C, S, K), lambda bb: (0, 0, 0)),            # d_net weight
            pl.BlockSpec((1, K), lambda bb: (0, 0)),                  # d_net bias
        ],
        out_specs=pl.BlockSpec((None, C, S), lambda bb: (bb, 0, 0)),
        compiler_params=pltpu.CompilerParams(
            dimension_semantics=("parallel",)),                       # independent per batch
    )(imgs3, noise3, rand, w, b)
    return out.reshape(B, C, H, W_IMG)


def reference(imgs3, noise3, rand, w, b):
    """Pure-JAX reference of the same forward pass (for validation)."""
    w2 = w.reshape(C * S, K)

    def func(x):
        logits = jnp.dot(x.reshape(B, C * S), w2,
                         precision=jax.lax.Precision.HIGHEST) + b
        cls = jnp.arange(K)[None, :]
        other = jnp.max(jnp.where(cls != LABEL, logits, -1e30), axis=-1)
        return logits[:, LABEL] - other                              # (B,)

    fx = func(_norm_img(imgs3 + noise3))
    wd = jnp.zeros((B, C, S), jnp.float32)
    nc = jnp.zeros((B,), jnp.float32)
    for j in range(NUM):
        tmp = rand[j] - 0.5
        nrm = jnp.sqrt(jnp.sum(tmp * tmp, axis=-1, keepdims=True))
        tmp = tmp / nrm * (SQRT_S * SIGMA)
        added = func(_norm_img(imgs3 + noise3 + tmp))
        c = fx - added
        wd = wd + tmp * c[:, None, None]
        nc = nc + c * c
    denom = jnp.sqrt(nc) + 1e-20
    return wd / denom[:, None, None] / SIGMA


if __name__ == "__main__":
    key = jax.random.PRNGKey(0)
    k1, k2, k3, k4, k5 = jax.random.split(key, 5)
    imgs = jax.random.uniform(k1, (B, C, H, W_IMG), jnp.float32)
    noise = (jax.random.uniform(k2, (B, C, H, W_IMG), jnp.float32) - 0.5) * 0.1
    # Deterministic stand-in for torch.rand_like inside try_noise (one draw per probe).
    rand = jax.random.uniform(k3, (NUM, B, C, S), jnp.float32)
    # Deterministic synthetic d_net parameters.
    w = jax.random.normal(k4, (C, S, K), jnp.float32) * 0.02
    b = jax.random.normal(k5, (1, K), jnp.float32) * 0.01

    out = parallel_noise(imgs, noise, rand, w, b)
    out = jax.block_until_ready(out)

    ref = reference(imgs.reshape(B, C, S), noise.reshape(B, C, S),
                    rand, w, b).reshape(B, C, H, W_IMG)
    assert out.shape == (B, C, H, W_IMG)
    max_err = float(jnp.max(jnp.abs(out - ref)))
    assert jnp.allclose(out, ref, rtol=5e-2, atol=5e-3), f"max_err={max_err}"
    print("KERNEL_OK")
</pallas_src>

<mosaic_0001>
module attributes {stable_mosaic.version = 11 : i64} {
  func.func @parallel_noise_kernel(%arg0: i32, %arg1: memref<1x4x256xf32, #tpu.memory_space<vmem>>, %arg2: memref<1x4x256xf32, #tpu.memory_space<vmem>>, %arg3: memref<4x1x4x256xf32, #tpu.memory_space<vmem>>, %arg4: memref<4x256x10xf32, #tpu.memory_space<vmem>>, %arg5: memref<1x10xf32, #tpu.memory_space<vmem>>, %arg6: memref<1x4x256xf32, #tpu.memory_space<vmem>>) attributes {dimension_semantics = [#tpu.dimension_semantics<parallel>], iteration_bounds = array<i64: 2>, scalar_prefetch = 0 : i64, scratch_operands = 0 : i64, tpu.core_type = #tpu.core_type<tc>, window_params = [{transform_indices = @transform_0, window_bounds = array<i64: 1, 4, 256>}, {transform_indices = @transform_1, window_bounds = array<i64: 1, 4, 256>}, {transform_indices = @transform_2, window_bounds = array<i64: 4, 1, 4, 256>}, {pipeline_mode = #tpu.pipeline_mode<synchronous>, transform_indices = @transform_3, window_bounds = array<i64: 4, 256, 10>}, {pipeline_mode = #tpu.pipeline_mode<synchronous>, transform_indices = @transform_4, window_bounds = array<i64: 1, 10>}, {transform_indices = @transform_5, window_bounds = array<i64: 1, 4, 256>}]} {
    %c0 = arith.constant 0 : index
    %c0_0 = arith.constant 0 : index
    %c0_1 = arith.constant 0 : index
    %0 = vector.load %arg1[%c0, %c0_0, %c0_1] : memref<1x4x256xf32, #tpu.memory_space<vmem>>, vector<1x4x256xf32>
    %1 = vector.shape_cast %0 : vector<1x4x256xf32> to vector<4x256xf32>
    %c0_2 = arith.constant 0 : index
    %c0_3 = arith.constant 0 : index
    %c0_4 = arith.constant 0 : index
    %2 = vector.load %arg2[%c0_2, %c0_3, %c0_4] : memref<1x4x256xf32, #tpu.memory_space<vmem>>, vector<1x4x256xf32>
    %3 = vector.shape_cast %2 : vector<1x4x256xf32> to vector<4x256xf32>
    %4 = arith.addf %1, %3 : vector<4x256xf32>
    %cst = arith.constant 0.000000e+00 : f32
    %cst_5 = arith.constant 1.000000e+00 : f32
    %5 = vector.broadcast %cst : f32 to vector<4x256xf32>
    %6 = arith.maximumf %5, %4 : vector<4x256xf32>
    %7 = vector.broadcast %cst_5 : f32 to vector<4x256xf32>
    %8 = arith.minimumf %7, %6 : vector<4x256xf32>
    %c0_6 = arith.constant 0 : index
    %c0_7 = arith.constant 0 : index
    %c0_8 = arith.constant 0 : index
    %c0_9 = arith.constant 0 : index
    %9 = vector.load %arg3[%c0_6, %c0_7, %c0_8, %c0_9] : memref<4x1x4x256xf32, #tpu.memory_space<vmem>>, vector<4x1x4x256xf32>
    %10 = vector.shape_cast %9 : vector<4x1x4x256xf32> to vector<4x4x256xf32>
    %cst_10 = arith.constant 5.000000e-01 : f32
    %11 = vector.broadcast %cst_10 : f32 to vector<4x4x256xf32>
    %12 = arith.subf %10, %11 : vector<4x4x256xf32>
    %13 = arith.mulf %12, %12 : vector<4x4x256xf32>
    %cst_11 = arith.constant dense<0.000000e+00> : vector<4x4xf32>
    %14 = vector.multi_reduction <add>, %13, %cst_11 [2] : vector<4x4x256xf32> to vector<4x4xf32>
    %15 = vector.shape_cast %14 : vector<4x4xf32> to vector<4x4x1xf32>
    %16 = math.rsqrt %15 : vector<4x4x1xf32>
    %cst_12 = arith.constant 1.600000e+00 : f32
    %17 = vector.broadcast %cst_12 : f32 to vector<4x4x1xf32>
    %18 = arith.mulf %16, %17 : vector<4x4x1xf32>
    %19 = vector.broadcast %18 : vector<4x4x1xf32> to vector<4x4x256xf32>
    %20 = arith.mulf %12, %19 : vector<4x4x256xf32>
    %21 = vector.shape_cast %4 : vector<4x256xf32> to vector<1x4x256xf32>
    %22 = vector.broadcast %21 : vector<1x4x256xf32> to vector<4x4x256xf32>
    %23 = arith.addf %22, %20 : vector<4x4x256xf32>
    %cst_13 = arith.constant 0.000000e+00 : f32
    %cst_14 = arith.constant 1.000000e+00 : f32
    %24 = vector.broadcast %cst_13 : f32 to vector<4x4x256xf32>
    %25 = arith.maximumf %24, %23 : vector<4x4x256xf32>
    %26 = vector.broadcast %cst_14 : f32 to vector<4x4x256xf32>
    %27 = arith.minimumf %26, %25 : vector<4x4x256xf32>
    %28 = vector.shape_cast %8 : vector<4x256xf32> to vector<1x4x256xf32>
    %29 = tpu.concatenate %28, %27 in 0 : vector<1x4x256xf32>, vector<4x4x256xf32> -> vector<5x4x256xf32>
    %30 = vector.extract_strided_slice %29 {offsets = [0, 0, 0], sizes = [5, 1, 256], strides = [1, 1, 1]} : vector<5x4x256xf32> to vector<5x1x256xf32>
    %31 = vector.shape_cast %30 : vector<5x1x256xf32> to vector<5x256xf32>
    %c0_15 = arith.constant 0 : index
    %c0_16 = arith.constant 0 : index
    %c0_17 = arith.constant 0 : index
    %32 = vector.load %arg4[%c0_15, %c0_16, %c0_17] : memref<4x256x10xf32, #tpu.memory_space<vmem>>, vector<1x256x10xf32>
    %33 = vector.shape_cast %32 : vector<1x256x10xf32> to vector<256x10xf32>
    %cst_18 = arith.constant dense<0.000000e+00> : vector<5x10xf32>
    %34 = tpu.matmul %31, %33, %cst_18 {dimension_numbers = #tpu.dot_dimension_numbers<[1], [0], [0], [1], [0, 0, 1, 1], [], []>} : vector<5x256xf32>, vector<256x10xf32>, vector<5x10xf32> -> vector<5x10xf32>
    %35 = vector.extract_strided_slice %29 {offsets = [0, 1, 0], sizes = [5, 1, 256], strides = [1, 1, 1]} : vector<5x4x256xf32> to vector<5x1x256xf32>
    %36 = vector.shape_cast %35 : vector<5x1x256xf32> to vector<5x256xf32>
    %c1 = arith.constant 1 : index
    %c0_19 = arith.constant 0 : index
    %c0_20 = arith.constant 0 : index
    %37 = vector.load %arg4[%c1, %c0_19, %c0_20] : memref<4x256x10xf32, #tpu.memory_space<vmem>>, vector<1x256x10xf32>
    %38 = vector.shape_cast %37 : vector<1x256x10xf32> to vector<256x10xf32>
    %cst_21 = arith.constant dense<0.000000e+00> : vector<5x10xf32>
    %39 = tpu.matmul %36, %38, %cst_21 {dimension_numbers = #tpu.dot_dimension_numbers<[1], [0], [0], [1], [0, 0, 1, 1], [], []>} : vector<5x256xf32>, vector<256x10xf32>, vector<5x10xf32> -> vector<5x10xf32>
    %40 = arith.addf %34, %39 : vector<5x10xf32>
    %41 = vector.extract_strided_slice %29 {offsets = [0, 2, 0], sizes = [5, 1, 256], strides = [1, 1, 1]} : vector<5x4x256xf32> to vector<5x1x256xf32>
    %42 = vector.shape_cast %41 : vector<5x1x256xf32> to vector<5x256xf32>
    %c2 = arith.constant 2 : index
    %c0_22 = arith.constant 0 : index
    %c0_23 = arith.constant 0 : index
    %43 = vector.load %arg4[%c2, %c0_22, %c0_23] : memref<4x256x10xf32, #tpu.memory_space<vmem>>, vector<1x256x10xf32>
    %44 = vector.shape_cast %43 : vector<1x256x10xf32> to vector<256x10xf32>
    %cst_24 = arith.constant dense<0.000000e+00> : vector<5x10xf32>
    %45 = tpu.matmul %42, %44, %cst_24 {dimension_numbers = #tpu.dot_dimension_numbers<[1], [0], [0], [1], [0, 0, 1, 1], [], []>} : vector<5x256xf32>, vector<256x10xf32>, vector<5x10xf32> -> vector<5x10xf32>
    %46 = arith.addf %40, %45 : vector<5x10xf32>
    %47 = vector.extract_strided_slice %29 {offsets = [0, 3, 0], sizes = [5, 1, 256], strides = [1, 1, 1]} : vector<5x4x256xf32> to vector<5x1x256xf32>
    %48 = vector.shape_cast %47 : vector<5x1x256xf32> to vector<5x256xf32>
    %c3 = arith.constant 3 : index
    %c0_25 = arith.constant 0 : index
    %c0_26 = arith.constant 0 : index
    %49 = vector.load %arg4[%c3, %c0_25, %c0_26] : memref<4x256x10xf32, #tpu.memory_space<vmem>>, vector<1x256x10xf32>
    %50 = vector.shape_cast %49 : vector<1x256x10xf32> to vector<256x10xf32>
    %cst_27 = arith.constant dense<0.000000e+00> : vector<5x10xf32>
    %51 = tpu.matmul %48, %50, %cst_27 {dimension_numbers = #tpu.dot_dimension_numbers<[1], [0], [0], [1], [0, 0, 1, 1], [], []>} : vector<5x256xf32>, vector<256x10xf32>, vector<5x10xf32> -> vector<5x10xf32>
    %52 = arith.addf %46, %51 : vector<5x10xf32>
    %c0_28 = arith.constant 0 : index
    %c0_29 = arith.constant 0 : index
    %53 = vector.load %arg5[%c0_28, %c0_29] : memref<1x10xf32, #tpu.memory_space<vmem>>, vector<1x10xf32>
    %54 = vector.broadcast %53 : vector<1x10xf32> to vector<5x10xf32>
    %55 = arith.addf %52, %54 : vector<5x10xf32>
    %56 = vector.extract_strided_slice %55 {offsets = [0, 0], sizes = [5, 1], strides = [1, 1]} : vector<5x10xf32> to vector<5x1xf32>
    %57 = vector.extract_strided_slice %55 {offsets = [0, 1], sizes = [5, 9], strides = [1, 1]} : vector<5x10xf32> to vector<5x9xf32>
    %cst_30 = arith.constant dense<0xFF800000> : vector<5xf32>
    %58 = vector.multi_reduction <maximumf>, %57, %cst_30 [1] : vector<5x9xf32> to vector<5xf32>
    %59 = vector.shape_cast %58 : vector<5xf32> to vector<5x1xf32>
    %60 = arith.subf %56, %59 : vector<5x1xf32>
    %61 = vector.extract_strided_slice %60 {offsets = [0, 0], sizes = [1, 1], strides = [1, 1]} : vector<5x1xf32> to vector<1x1xf32>
    %62 = vector.extract_strided_slice %60 {offsets = [1, 0], sizes = [4, 1], strides = [1, 1]} : vector<5x1xf32> to vector<4x1xf32>
    %63 = vector.broadcast %61 : vector<1x1xf32> to vector<4x1xf32>
    %64 = arith.subf %63, %62 : vector<4x1xf32>
    %65 = vector.shape_cast %64 : vector<4x1xf32> to vector<4x1x1xf32>
    %66 = vector.broadcast %65 : vector<4x1x1xf32> to vector<4x4x256xf32>
    %67 = arith.mulf %20, %66 : vector<4x4x256xf32>
    %cst_31 = arith.constant dense<0.000000e+00> : vector<4x256xf32>
    %68 = vector.multi_reduction <add>, %67, %cst_31 [0] : vector<4x4x256xf32> to vector<4x256xf32>
    %69 = arith.mulf %64, %64 : vector<4x1xf32>
    %cst_32 = arith.constant dense<0.000000e+00> : vector<1xf32>
    %70 = vector.multi_reduction <add>, %69, %cst_32 [0] : vector<4x1xf32> to vector<1xf32>
    %71 = vector.shape_cast %70 : vector<1xf32> to vector<1x1xf32>
    %72 = math.sqrt %71 : vector<1x1xf32>
    %cst_33 = arith.constant 9.99999968E-21 : f32
    %73 = vector.broadcast %cst_33 : f32 to vector<1x1xf32>
    %74 = arith.addf %72, %73 : vector<1x1xf32>
    %75 = tpu.reciprocal %74 {approx = true} : vector<1x1xf32> -> vector<1x1xf32>
    %cst_34 = arith.constant 1.000000e+01 : f32
    %76 = vector.broadcast %cst_34 : f32 to vector<1x1xf32>
    %77 = arith.mulf %75, %76 : vector<1x1xf32>
    %78 = vector.broadcast %77 : vector<1x1xf32> to vector<4x256xf32>
    %79 = arith.mulf %68, %78 : vector<4x256xf32>
    %c0_35 = arith.constant 0 : index
    %c0_36 = arith.constant 0 : index
    %c0_37 = arith.constant 0 : index
    %80 = vector.load %arg6[%c0_35, %c0_36, %c0_37] : memref<1x4x256xf32, #tpu.memory_space<vmem>>, vector<1x4x256xf32>
    %81 = vector.shape_cast %80 : vector<1x4x256xf32> to vector<4x256xf32>
    %82 = vector.shape_cast %79 : vector<4x256xf32> to vector<1x4x256xf32>
    tpu.vector_store %arg6[%c0_35, %c0_36, %c0_37], %82 {strides = array<i32>} : memref<1x4x256xf32, #tpu.memory_space<vmem>>, vector<1x4x256xf32>,
    return
  }
  func.func @transform_0(%arg0: i32) -> (i32, i32, i32) {
    %c0_i32 = arith.constant 0 : i32
    %c0_i32_0 = arith.constant 0 : i32
    %c0_i32_1 = arith.constant 0 : i32
    return %arg0, %c0_i32, %c0_i32_0 : i32, i32, i32
  }
  func.func @transform_1(%arg0: i32) -> (i32, i32, i32) {
    %c0_i32 = arith.constant 0 : i32
    %c0_i32_0 = arith.constant 0 : i32
    %c0_i32_1 = arith.constant 0 : i32
    return %arg0, %c0_i32, %c0_i32_0 : i32, i32, i32
  }
  func.func @transform_2(%arg0: i32) -> (i32, i32, i32, i32) {
    %c0_i32 = arith.constant 0 : i32
    %c0_i32_0 = arith.constant 0 : i32
    %c0_i32_1 = arith.constant 0 : i32
    %c0_i32_2 = arith.constant 0 : i32
    return %c0_i32, %arg0, %c0_i32_0, %c0_i32_1 : i32, i32, i32, i32
  }
  func.func @transform_3(%arg0: i32) -> (i32, i32, i32) {
    %c0_i32 = arith.constant 0 : i32
    %c0_i32_0 = arith.constant 0 : i32
    %c0_i32_1 = arith.constant 0 : i32
    %c0_i32_2 = arith.constant 0 : i32
    return %c0_i32, %c0_i32_0, %c0_i32_1 : i32, i32, i32
  }
  func.func @transform_4(%arg0: i32) -> (i32, i32) {
    %c0_i32 = arith.constant 0 : i32
    %c0_i32_0 = arith.constant 0 : i32
    %c0_i32_1 = arith.constant 0 : i32
    return %c0_i32, %c0_i32_0 : i32, i32
  }
  func.func @transform_5(%arg0: i32) -> (i32, i32, i32) {
    %c0_i32 = arith.constant 0 : i32
    %c0_i32_0 = arith.constant 0 : i32
    %c0_i32_1 = arith.constant 0 : i32
    return %arg0, %c0_i32, %c0_i32_0 : i32, i32, i32
  }
}

</mosaic_0001>

<bundles_post_ra>
// kernel: tpu_custom_call.1
= control target key start
LH: loop header
LB: loop body
LE: loop exit
PB: predicated region body
PF: predicated region fallthrough
CT: control target
= control target key end

     0   :  { %10 = vsyncpa [#allocation4], 0  ;;  %s2039_s0 = inlined_call_operand.vmem [shape: f32[2,4,256], index: 0, kind: input, shape index: {}]   ;;  %s2040_s1 = inlined_call_operand.vmem [shape: f32[2,4,256], index: 1, kind: input, shape index: {}]   ;;  %s2041_s2 = inlined_call_operand.vmem [shape: f32[4,2,4,256], index: 2, kind: input, shape index: {}]   ;;  %s2042_s3 = inlined_call_operand.vmem [shape: f32[4,256,10], index: 3, kind: input, shape index: {}]   ;;  %s2043_s4 = inlined_call_operand.vmem [shape: f32[1,10], index: 4, kind: input, shape index: {}]   ;;  %s2044_s5 = inlined_call_operand.hbm [shape: f32[2,4,256], index: 5, kind: output, shape index: {}]  }
   0x1   :  { %12 = vsyncpa [#allocation4 + $0x1], 0  ;;  %s1350_s18 = smov 0   ;;  %s1352_s19 = smov 0  }
   0x2   :  { %s1354_s20 = smov 0   ;;  %s1356_s21 = smov 0  }
   0x3 LB: > { %s1371_s22 = sadd.s32 4294967295, %s1316_s21   ;;  %s1075_s23 = sadd.s32 4294967294, %s1316_s21   ;;  %s1316_s21 = sphi %s1356_s21, %s2050_s21   ;;  %s1312_s20 = sphi %s1354_s20, %s2049_s20   ;;  %s1308_s19 = sphi %s1352_s19, %s2048_s19   ;;  %s1304_s18 = sphi %s1350_s18, %s2047_s18  }
   0x4   : > { %s1375_s24 = sadd.s32 1, %s1316_s21   ;;  %s77_s25 = sadd.s32 1, %s1312_s20 }
   0x5   : > { %s74_s26 = ssub.s32 %s1316_s21, %s1375_s24  ;;  %p84_p0 = scmp.ne.s32.totalorder %s1312_s20, %s1308_s19 }
   0x6   : > { %p75_p1 = scmp.eq.s32.totalorder %s74_s26, 0  ;;  %p85_p2 = scmp.eq.s32.totalorder %s1316_s21, 0 }
   0x7   : > { %p156_p3 = scmp.eq.s32.totalorder %s1371_s22, 1  ;;  %p161_p4 = scmp.ne.s32.totalorder %s1308_s19, %s1304_s18 }
   0x8   : > { %s1387_s27 = scalar_select %p75_p1, %s1312_s20, %s77_s25  }
   0x9   : > { %p86_p5 = por %p85_p2, %p84_p0  ;;  %p1389_p6 = por %p156_p3, %p84_p0 }
   0xa   : > { %p162_p7 = scmp.eq.s32.totalorder %s1075_s23, 1  ;;  %p1077_p9 = scmp.ge.s32.totalorder %s1316_s21, 2 }
   0xc   : > { %p1393_p8 = por %p162_p7, %p161_p4  ;;  %184 = sbr.rel (%p1077_p9) target bundleno = 25 (0x19), region = 24 }
  0x11   : > { %203 = sbr.rel (!%p86_p5) target bundleno = 25 (0x19), region = 36  ;;  %s205_s30 = sand.u32 (%p86_p5), 1, %s1312_s20  }
  0x12   : > { %s1193_s6 = sshll.u32 (%p86_p5), %s1316_s21, 3  ;;  %s1078_s7 = sshll.u32 (%p86_p5), %s205_s30, 5 }
  0x13   : > { %s210_s10 = scalar_lea.vmem (%p86_p5), %s2041_s2, %s1193_s6  ;;  %s207_s11 = scalar_lea.vmem (%p86_p5), [#allocation2], %s1078_s7 }
  0x14   : > { %v245_v0 = vld [vmem:[%s210_s10] sm:$0xff] (%p86_p5)  ;;  %v247_v1 = vld [vmem:[%s210_s10 + $0x10] sm:$0xff] (%p86_p5) }
  0x15   : > { %v249_v2 = vld [vmem:[%s210_s10 + $0x20] sm:$0xff] (%p86_p5)  ;;  %246 = vst [vmem:[%s207_s11] sm:$0xff] (%p86_p5), %v245_v0  ;;  %v251_v3 = vld [vmem:[%s210_s10 + $0x30] sm:$0xff] (%p86_p5) }
  0x16   : > { %248 = vst [vmem:[%s207_s11 + $0x8] sm:$0xff] %v247_v1 }
  0x17   : > { %250 = vst [vmem:[%s207_s11 + $0x10] sm:$0xff] %v249_v2 }
  0x18   : > { %252 = vst [vmem:[%s207_s11 + $0x18] sm:$0xff] %v251_v3 }
  0x19 PF: > { %p1081_p10 = scmp.ge.s32.totalorder %s1316_s21, 1  ;;  %p257_p11 = scmp.lt.s32.totalorder %s1316_s21, 3 }
  0x1b   : > { %p258_p12 = pnand %p1081_p10, %p257_p11 }
  0x1c   : > { %s1408_s12 = sand.u32 (!%p258_p12), 1, %s1308_s19   ;;  %p301_p13 = scmp.lt.s32.totalorder (!%p258_p12), %s1371_s22, 1 }
  0x1d   : > { %261 = sbr.rel (%p258_p12) target bundleno = 635 (0x27b), region = 74  ;;  %s1082_s25 = sshll.u32 (!%p258_p12), %s1408_s12, 5 }
  0x1e   : > { %s266_s17 = scalar_lea.vmem (!%p258_p12), [#allocation2], %s1082_s25  ;;  %s1083_s14 = sshll.u32 (!%p258_p12), %s1408_s12, 3 }
  0x1f   : > { %s1196_s15 = sshll.u32 (!%p258_p12), %s1371_s22, 3  ;;  %s970_s30 = scalar_lea.sflag (!%p258_p12), [#allocation4], %s1408_s12 }
  0x20   : > { %s981_s16 = scalar_lea.hbm (!%p258_p12), %s2044_s5, %s1196_s15  ;;  %s1274_s8 = scalar_lea.hbm (!%p258_p12), %s2044_s5, 16 }
  0x22   : > { %v1107_v4 = vld [vmem:[%s2042_s3 + $0x178] sm:$0xff]  ;;  %v1106_v8 = vld [vmem:[%s2042_s3 + $0x170] sm:$0xff]  ;;  %v1105_v12 = vld [vmem:[%s2042_s3 + $0x168] sm:$0xff]  ;;  %vm355_vm0 = vcmask 1043456   ;;  %s1721_s26 = scalar_select %p301_p13, %s1371_s22, 1  ;;  %vm540_vm13 = vcmask 1041409  }
  0x23   : > { %v1123_v5 = vld [vmem:[%s2042_s3 + $0x1f8] sm:$0xff]  ;;  %554 = vmatpush.msra.mxu0 %v1107_v4  ;;  %v1122_v9 = vld [vmem:[%s2042_s3 + $0x1f0] sm:$0xff]  ;;  %v316_v14 = vld [vmem:[%s266_s17] sm:$0xff]  ;;  %vm542_vm14 = vcmask 1042434   ;;  %vm544_vm15 = vcmask 1043459   ;;  %s300_s22 = scalar_lea.vmem [#allocation3], %s1083_s14 }
  0x24   : > { %v475_v6 = vld [vmem:[%s2042_s3 + $0x78] sm:$0xff]  ;;  %574 = vmatpush.msra.mxu1 %v1123_v5  ;;  %v474_v10 = vld [vmem:[%s2042_s3 + $0x70] sm:$0xff]  ;;  %v319_v15 = vld [vmem:[%s266_s17 + $0x18] sm:$0xff]  ;;  %v1440_v17 = vadd.f32 -0.5, %v316_v14  ;;  %s1194_s10 = sshll.u32 %s1721_s26, 3 }
  0x25   : > { %v491_v7 = vld [vmem:[%s2042_s3 + $0xf8] sm:$0xff]  ;;  %614 = vmatpush.msra.mxu2 %v475_v6  ;;  %v490_v11 = vld [vmem:[%s2042_s3 + $0xf0] sm:$0xff]  ;;  %555 = vmatpush.msra.mxu0 %v1106_v8  ;;  %v1442_v18 = vadd.f32 -0.5, %v319_v15  ;;  %v1121_v20 = vld [vmem:[%s2042_s3 + $0x1e8] sm:$0xff]  ;;  %s305_s11 = scalar_lea.vmem %s2039_s0, %s1194_s10  ;;  %s310_s23 = scalar_lea.vmem %s2040_s1, %s1194_s10 }
  0x26   : > { %634 = vmatpush.msra.mxu3 %v491_v7  ;;  %v318_v13 = vld [vmem:[%s266_s17 + $0x10] sm:$0xff]  ;;  %575 = vmatpush.msra.mxu1 %v1122_v9  ;;  %v317_v19 = vld [vmem:[%s266_s17 + $0x8] sm:$0xff]  ;;  %v473_v21 = vld [vmem:[%s2042_s3 + $0x68] sm:$0xff]  ;;  %v324_v27 = vmul.f32 %v1440_v17, %v1440_v17  ;;  %s983_s17 = sshll.u32 %s300_s22, 4  ;;  %s984_s17 = int_to_ptr.vmem [resolvable:$true] %s983_s17 }
  0x27   : > { %v1438_v16 = vadd.f32 -0.5, %v318_v13  ;;  %615 = vmatpush.msra.mxu2 %v474_v10  ;;  %v1450_v22 = vadd.f32 -0.5, %v317_v19  ;;  %556 = vmatpush.msra.mxu0 %v1105_v12  ;;  %v489_v23 = vld [vmem:[%s2042_s3 + $0xe8] sm:$0xff]  ;;  %v1104_v24 = vld [vmem:[%s2042_s3 + $0x160] sm:$0xff]  ;;  %v327_v28 = vmul.f32 %v1442_v18, %v1442_v18  ;;  %v1103_v31 = vld [vmem:[%s2042_s3 + $0x158] sm:$0xff] }
  0x28   : > { %635 = vmatpush.msra.mxu3 %v490_v11  ;;  %576 = vmatpush.msra.mxu1 %v1121_v20  ;;  %v1120_v25 = vld [vmem:[%s2042_s3 + $0x1e0] sm:$0xff]  ;;  %v1119_v33 = vld [vmem:[%s2042_s3 + $0x1d8] sm:$0xff]  ;;  %v1102_v36 = vld [vmem:[%s2042_s3 + $0x150] sm:$0xff]  ;;  %332 = vst [vmem:[#allocation1] ss:$2 sm:$0xff] %v324_v27 }
  0x29   : > { %v326_v26 = vmul.f32 %v1438_v16, %v1438_v16  ;;  %616 = vmatpush.msra.mxu2 %v473_v21  ;;  %v472_v29 = vld [vmem:[%s2042_s3 + $0x60] sm:$0xff]  ;;  %v325_v32 = vmul.f32 %v1450_v22, %v1450_v22  ;;  %557 = vmatpush.msra.mxu0 %v1104_v24  ;;  %v471_v34 = vld [vmem:[%s2042_s3 + $0x58] sm:$0xff]  ;;  %v1118_v37 = vld [vmem:[%s2042_s3 + $0x1d0] sm:$0xff]  ;;  %344 = vst [vmem:[#allocation1 + $0x30] ss:$2 sm:$0xff] %v327_v28 }
  0x2a   : > { %636 = vmatpush.msra.mxu3 %v489_v23  ;;  %v488_v30 = vld [vmem:[%s2042_s3 + $0xe0] sm:$0xff]  ;;  %577 = vmatpush.msra.mxu1 %v1120_v25  ;;  %v487_v35 = vld [vmem:[%s2042_s3 + $0xd8] sm:$0xff]  ;;  %v470_v38 = vld [vmem:[%s2042_s3 + $0x50] sm:$0xff] }
  0x2b   : > { %340 = vst [vmem:[#allocation1 + $0x20] ss:$2 sm:$0xff] %v326_v26  ;;  %617 = vmatpush.msra.mxu2 %v472_v29  ;;  %558 = vmatpush.msra.mxu0 %v1103_v31  ;;  %v486_v39 = vld [vmem:[%s2042_s3 + $0xd0] sm:$0xff]  ;;  %v1101_v60 = vld [vmem:[%s2042_s3 + $0x148] sm:$0xff]  ;;  %v1100_v0 = vld [vmem:[%s2042_s3 + $0x140] sm:$0xff] }
  0x2c   : > { %637 = vmatpush.msra.mxu3 %v488_v30  ;;  %578 = vmatpush.msra.mxu1 %v1119_v33  ;;  %336 = vst [vmem:[#allocation1 + $0x10] ss:$2 sm:$0xff] %v325_v32  ;;  %v1117_v61 = vld [vmem:[%s2042_s3 + $0x1c8] sm:$0xff]  ;;  %v1116_v1 = vld [vmem:[%s2042_s3 + $0x1c0] sm:$0xff]  ;;  %v1099_v4 = vld [vmem:[%s2042_s3 + $0x138] sm:$0xff] }
  0x2d   : > { %618 = vmatpush.msra.mxu2 %v471_v34  ;;  %559 = vmatpush.msra.mxu0 %v1102_v36  ;;  %v469_v62 = vld [vmem:[%s2042_s3 + $0x48] sm:$0xff]  ;;  %v468_v2 = vld [vmem:[%s2042_s3 + $0x40] sm:$0xff]  ;;  %v1115_v5 = vld [vmem:[%s2042_s3 + $0x1b8] sm:$0xff] }
  0x2e   : > { %638 = vmatpush.msra.mxu3 %v487_v35  ;;  %579 = vmatpush.msra.mxu1 %v1118_v37  ;;  %v485_v63 = vld [vmem:[%s2042_s3 + $0xc8] sm:$0xff]  ;;  %v484_v3 = vld [vmem:[%s2042_s3 + $0xc0] sm:$0xff]  ;;  %v467_v6 = vld [vmem:[%s2042_s3 + $0x38] sm:$0xff] }
  0x2f   : > { %619 = vmatpush.msra.mxu2 %v470_v38  ;;  %v333_v44 = vld.sshfl [vmem:[#allocation1] sm:$0xff pattern:$0x75316420]  ;;  %v334_v46 = vld.sshfl [vmem:[#allocation1 + $0x8] sm:$0xff pattern:$0x75316420]  ;;  %560 = vmatpush.msra.mxu0 %v1101_v60 }
  0x30   : > { %639 = vmatpush.msra.mxu3 %v486_v39  ;;  %v356_v47 = vsel %vm355_vm0, %v333_v44, 0.0  ;;  %v357_v48 = vsel %vm355_vm0, %v334_v46, 0.0  ;;  %v345_v49 = vld.sshfl [vmem:[#allocation1 + $0x30] sm:$0xff pattern:$0x75316420]  ;;  %580 = vmatpush.msra.mxu1 %v1117_v61  ;;  %v483_v7 = vld [vmem:[%s2042_s3 + $0xb8] sm:$0xff] }
  0x31   : > { %v358_v50 = vadd.f32 %v357_v48, %v356_v47  ;;  %v346_v51 = vld.sshfl [vmem:[#allocation1 + $0x38] sm:$0xff pattern:$0x75316420]  ;;  %v371_v52 = vsel %vm355_vm0, %v345_v49, 0.0  ;;  %620 = vmatpush.msra.mxu2 %v469_v62  ;;  %561 = vmatpush.msra.mxu0 %v1100_v0  ;;  %v1098_v8 = vld [vmem:[%s2042_s3 + $0x130] sm:$0xff]  ;;  %v1097_v12 = vld [vmem:[%s2042_s3 + $0x128] sm:$0xff] }
  0x32   : > { %v341_v40 = vld.sshfl [vmem:[#allocation1 + $0x20] sm:$0xff pattern:$0x75316420]  ;;  %v342_v41 = vld.sshfl [vmem:[#allocation1 + $0x28] sm:$0xff pattern:$0x75316420]  ;;  %640 = vmatpush.msra.mxu3 %v485_v63  ;;  %581 = vmatpush.msra.mxu1 %v1116_v1 }
  0x33   : > { %v366_v42 = vsel %vm355_vm0, %v341_v40, 0.0  ;;  %v367_v43 = vsel %vm355_vm0, %v342_v41, 0.0  ;;  %v372_v53 = vsel %vm355_vm0, %v346_v51, 0.0  ;;  %v337_v54 = vld.sshfl [vmem:[#allocation1 + $0x10] sm:$0xff pattern:$0x75316420]  ;;  %359 = vadd.xlane.f32.xlu0 %v358_v50  ;;  %621 = vmatpush.msra.mxu2 %v468_v2 }
  0x34   : > { %v368_v45 = vadd.f32 %v367_v43, %v366_v42  ;;  %v338_v55 = vld.sshfl [vmem:[#allocation1 + $0x18] sm:$0xff pattern:$0x75316420]  ;;  %v361_v56 = vsel %vm355_vm0, %v337_v54, 0.0  ;;  %v373_v58 = vadd.f32 %v372_v53, %v371_v52  ;;  %641 = vmatpush.msra.mxu3 %v484_v3  ;;  %562 = vmatpush.msra.mxu0 %v1099_v4  ;;  %v1114_v9 = vld [vmem:[%s2042_s3 + $0x1b0] sm:$0xff]  ;;  %v1113_v13 = vld [vmem:[%s2042_s3 + $0x1a8] sm:$0xff] }
  0x35   : > { %v362_v57 = vsel %vm355_vm0, %v338_v55, 0.0  ;;  %582 = vmatpush.msra.mxu1 %v1115_v5  ;;  %622 = vmatpush.msra.mxu2 %v467_v6  ;;  %v466_v10 = vld [vmem:[%s2042_s3 + $0x30] sm:$0xff]  ;;  %v465_v14 = vld [vmem:[%s2042_s3 + $0x28] sm:$0xff]  ;;  %v1096_v19 = vld [vmem:[%s2042_s3 + $0x120] sm:$0xff] }
  0x36   : > { %369 = vadd.xlane.f32.xlu1 %v368_v45  ;;  %v363_v59 = vadd.f32 %v362_v57, %v361_v56  ;;  %642 = vmatpush.msra.mxu3 %v483_v7  ;;  %v482_v11 = vld [vmem:[%s2042_s3 + $0xb0] sm:$0xff]  ;;  %v481_v15 = vld [vmem:[%s2042_s3 + $0xa8] sm:$0xff]  ;;  %v1112_v20 = vld [vmem:[%s2042_s3 + $0x1a0] sm:$0xff] }
  0x37   : > { %563 = vmatpush.msra.mxu0 %v1098_v8  ;;  %583 = vmatpush.msra.mxu1 %v1114_v9  ;;  %v464_v21 = vld [vmem:[%s2042_s3 + $0x20] sm:$0xff]  ;;  %v1095_v24 = vld [vmem:[%s2042_s3 + $0x118] sm:$0xff]  ;;  %v1094_v28 = vld [vmem:[%s2042_s3 + $0x110] sm:$0xff] }
  0x38   : > { %623 = vmatpush.msra.mxu2 %v466_v10  ;;  %643 = vmatpush.msra.mxu3 %v482_v11  ;;  %v480_v23 = vld [vmem:[%s2042_s3 + $0xa0] sm:$0xff]  ;;  %v1111_v25 = vld [vmem:[%s2042_s3 + $0x198] sm:$0xff]  ;;  %v1110_v29 = vld [vmem:[%s2042_s3 + $0x190] sm:$0xff] }
  0x39   : > { %564 = vmatpush.msra.mxu0 %v1097_v12  ;;  %584 = vmatpush.msra.mxu1 %v1113_v13  ;;  %v463_v26 = vld [vmem:[%s2042_s3 + $0x18] sm:$0xff]  ;;  %v462_v30 = vld [vmem:[%s2042_s3 + $0x10] sm:$0xff]  ;;  %v1093_v32 = vld [vmem:[%s2042_s3 + $0x108] sm:$0xff] }
  0x3a   : > { %624 = vmatpush.msra.mxu2 %v465_v14  ;;  %644 = vmatpush.msra.mxu3 %v481_v15  ;;  %v479_v27 = vld [vmem:[%s2042_s3 + $0x98] sm:$0xff]  ;;  %v478_v31 = vld [vmem:[%s2042_s3 + $0x90] sm:$0xff]  ;;  %v1109_v33 = vld [vmem:[%s2042_s3 + $0x188] sm:$0xff] }
  0x3b   : > { %364 = vadd.xlane.f32.xlu0 %v363_v59  ;;  %565 = vmatpush.msra.mxu0 %v1096_v19  ;;  %v461_v34 = vld [vmem:[%s2042_s3 + $0x8] sm:$0xff]  ;;  %v1092_v36 = vld [vmem:[%s2042_s3 + $0x100] sm:$0xff]  ;;  %v1139_v40 = vld [vmem:[%s2042_s3 + $0x278] sm:$0xff] }
  0x3c   : > { %585 = vmatpush.msra.mxu1 %v1112_v20  ;;  %625 = vmatpush.msra.mxu2 %v464_v21  ;;  %v477_v35 = vld [vmem:[%s2042_s3 + $0x88] sm:$0xff]  ;;  %v1108_v37 = vld [vmem:[%s2042_s3 + $0x180] sm:$0xff]  ;;  %v1155_v41 = vld [vmem:[%s2042_s3 + $0x2f8] sm:$0xff] }
  0x3d   : > { %645 = vmatpush.msra.mxu3 %v480_v23  ;;  %566 = vmatpush.msra.mxu0 %v1095_v24  ;;  %v460_v38 = vld [vmem:[%s2042_s3] sm:$0xff]  ;;  %v1171_v42 = vld [vmem:[%s2042_s3 + $0x378] sm:$0xff]  ;;  %v1138_v44 = vld [vmem:[%s2042_s3 + $0x270] sm:$0xff] }
  0x3e   : > { %374 = vadd.xlane.f32.xlu1 %v373_v58  ;;  %586 = vmatpush.msra.mxu1 %v1111_v25  ;;  %v476_v39 = vld [vmem:[%s2042_s3 + $0x80] sm:$0xff]  ;;  %v1187_v43 = vld [vmem:[%s2042_s3 + $0x3f8] sm:$0xff]  ;;  %v1154_v45 = vld [vmem:[%s2042_s3 + $0x2f0] sm:$0xff] }
  0x3f   : > { %626 = vmatpush.msra.mxu2 %v463_v26  ;;  %646 = vmatpush.msra.mxu3 %v479_v27  ;;  %v1170_v46 = vld [vmem:[%s2042_s3 + $0x370] sm:$0xff]  ;;  %v1137_v48 = vld [vmem:[%s2042_s3 + $0x268] sm:$0xff]  ;;  %v1136_v52 = vld [vmem:[%s2042_s3 + $0x260] sm:$0xff] }
  0x40   : > { %567 = vmatpush.msra.mxu0 %v1094_v28  ;;  %587 = vmatpush.msra.mxu1 %v1110_v29  ;;  %v1186_v47 = vld [vmem:[%s2042_s3 + $0x3f0] sm:$0xff]  ;;  %v1153_v49 = vld [vmem:[%s2042_s3 + $0x2e8] sm:$0xff]  ;;  %v1152_v53 = vld [vmem:[%s2042_s3 + $0x2e0] sm:$0xff] }
  0x41   : > { %627 = vmatpush.msra.mxu2 %v462_v30  ;;  %647 = vmatpush.msra.mxu3 %v478_v31  ;;  %v1169_v50 = vld [vmem:[%s2042_s3 + $0x368] sm:$0xff]  ;;  %v1168_v54 = vld [vmem:[%s2042_s3 + $0x360] sm:$0xff]  ;;  %v1135_v56 = vld [vmem:[%s2042_s3 + $0x258] sm:$0xff] }
  0x42   : > { %568 = vmatpush.msra.mxu0 %v1093_v32  ;;  %588 = vmatpush.msra.mxu1 %v1109_v33  ;;  %v1185_v51 = vld [vmem:[%s2042_s3 + $0x3e8] sm:$0xff]  ;;  %v1184_v55 = vld [vmem:[%s2042_s3 + $0x3e0] sm:$0xff]  ;;  %v1151_v57 = vld [vmem:[%s2042_s3 + $0x2d8] sm:$0xff] }
  0x43   : > { %628 = vmatpush.msra.mxu2 %v461_v34  ;;  %648 = vmatpush.msra.mxu3 %v477_v35  ;;  %v1167_v58 = vld [vmem:[%s2042_s3 + $0x358] sm:$0xff]  ;;  %v1134_v61 = vld [vmem:[%s2042_s3 + $0x250] sm:$0xff]  ;;  %v1133_v2 = vld [vmem:[%s2042_s3 + $0x248] sm:$0xff] }
  0x44   : > { %569 = vmatpush.msra.mxu0 %v1092_v36  ;;  %589 = vmatpush.msra.mxu1 %v1108_v37  ;;  %v1183_v60 = vld [vmem:[%s2042_s3 + $0x3d8] sm:$0xff]  ;;  %v1150_v62 = vld [vmem:[%s2042_s3 + $0x2d0] sm:$0xff]  ;;  %v1149_v3 = vld [vmem:[%s2042_s3 + $0x2c8] sm:$0xff]  ;;  %v1318_v37 = vmov 839922192  }
  0x45   : > { %629 = vmatpush.msra.mxu2 %v460_v38  ;;  %649 = vmatpush.msra.mxu3 %v476_v39  ;;  %v1166_v63 = vld [vmem:[%s2042_s3 + $0x350] sm:$0xff]  ;;  %v1165_v4 = vld [vmem:[%s2042_s3 + $0x348] sm:$0xff]  ;;  %v1132_v6 = vld [vmem:[%s2042_s3 + $0x240] sm:$0xff]  ;;  %v425_v38 = vunpack.c.l.s4 %v1318_v37 }
  0x46   : > { %707 = vmatpush.msrb.mxu0 %v1139_v40  ;;  %727 = vmatpush.msrb.mxu1 %v1155_v41  ;;  %v1182_v1 = vld [vmem:[%s2042_s3 + $0x3d0] sm:$0xff]  ;;  %v1181_v5 = vld [vmem:[%s2042_s3 + $0x3c8] sm:$0xff]  ;;  %v1148_v7 = vld [vmem:[%s2042_s3 + $0x2c0] sm:$0xff] }
  0x47   : > { %801 = vmatpush.msrb.mxu2 %v1171_v42  ;;  %821 = vmatpush.msrb.mxu3 %v1187_v43  ;;  %v1164_v8 = vld [vmem:[%s2042_s3 + $0x340] sm:$0xff]  ;;  %v1131_v11 = vld [vmem:[%s2042_s3 + $0x238] sm:$0xff]  ;;  %v1130_v20 = vld [vmem:[%s2042_s3 + $0x230] sm:$0xff] }
  0x48   : > { %708 = vmatpush.msrb.mxu0 %v1138_v44  ;;  %728 = vmatpush.msrb.mxu1 %v1154_v45  ;;  %v1180_v9 = vld [vmem:[%s2042_s3 + $0x3c0] sm:$0xff]  ;;  %v1147_v12 = vld [vmem:[%s2042_s3 + $0x2b8] sm:$0xff]  ;;  %v1146_v21 = vld [vmem:[%s2042_s3 + $0x2b0] sm:$0xff] }
  0x49   : > { %802 = vmatpush.msrb.mxu2 %v1170_v46  ;;  %822 = vmatpush.msrb.mxu3 %v1186_v47  ;;  %v1163_v13 = vld [vmem:[%s2042_s3 + $0x338] sm:$0xff]  ;;  %v1162_v24 = vld [vmem:[%s2042_s3 + $0x330] sm:$0xff]  ;;  %v1129_v29 = vld [vmem:[%s2042_s3 + $0x228] sm:$0xff] }
  0x4a   : > { %709 = vmatpush.msrb.mxu0 %v1137_v48  ;;  %729 = vmatpush.msrb.mxu1 %v1153_v49  ;;  %v1179_v19 = vld [vmem:[%s2042_s3 + $0x3b8] sm:$0xff]  ;;  %v1178_v25 = vld [vmem:[%s2042_s3 + $0x3b0] sm:$0xff]  ;;  %v1145_v30 = vld [vmem:[%s2042_s3 + $0x2a8] sm:$0xff] }
  0x4b   : > { %803 = vmatpush.msrb.mxu2 %v1169_v50  ;;  %823 = vmatpush.msrb.mxu3 %v1185_v51  ;;  %v1161_v31 = vld [vmem:[%s2042_s3 + $0x328] sm:$0xff]  ;;  %v1128_v35 = vld [vmem:[%s2042_s3 + $0x220] sm:$0xff]  ;;  %v1127_v45 = vld [vmem:[%s2042_s3 + $0x218] sm:$0xff] }
  0x4c   : > { %710 = vmatpush.msrb.mxu0 %v1136_v52  ;;  %730 = vmatpush.msrb.mxu1 %v1152_v53  ;;  %v1177_v32 = vld [vmem:[%s2042_s3 + $0x3a8] sm:$0xff]  ;;  %v1144_v36 = vld [vmem:[%s2042_s3 + $0x2a0] sm:$0xff]  ;;  %v1143_v46 = vld [vmem:[%s2042_s3 + $0x298] sm:$0xff] }
  0x4d   : > { %804 = vmatpush.msrb.mxu2 %v1168_v54  ;;  %824 = vmatpush.msrb.mxu3 %v1184_v55  ;;  %v1160_v39 = vld [vmem:[%s2042_s3 + $0x320] sm:$0xff]  ;;  %v1159_v47 = vld [vmem:[%s2042_s3 + $0x318] sm:$0xff]  ;;  %v1126_v53 = vld [vmem:[%s2042_s3 + $0x210] sm:$0xff]  ;;  %v1831_v55 = vunpack.c.0.s8 %v425_v38 }
  0x4e   : > { %711 = vmatpush.msrb.mxu0 %v1135_v56  ;;  %731 = vmatpush.msrb.mxu1 %v1151_v57  ;;  %v1176_v40 = vld [vmem:[%s2042_s3 + $0x3a0] sm:$0xff]  ;;  %v1175_v52 = vld [vmem:[%s2042_s3 + $0x398] sm:$0xff]  ;;  %v1142_v56 = vld [vmem:[%s2042_s3 + $0x290] sm:$0xff] }
  0x4f   : > { %805 = vmatpush.msrb.mxu2 %v1167_v58  ;;  %825 = vmatpush.msrb.mxu3 %v1183_v60  ;;  %v311_v44 = vld [vmem:[%s305_s11] sm:$0xff]  ;;  %v1158_v57 = vld [vmem:[%s2042_s3 + $0x310] sm:$0xff] }
  0x50   : > { %712 = vmatpush.msrb.mxu0 %v1134_v61  ;;  %732 = vmatpush.msrb.mxu1 %v1150_v62  ;;  %v312_v48 = vld [vmem:[%s310_s23] sm:$0xff]  ;;  %v1174_v62 = vld [vmem:[%s2042_s3 + $0x390] sm:$0xff]  ;;  %s985_s23 = sshll.u32 %s981_s16, 4  ;;  %s986_s23 = int_to_ptr.hbm [resolvable:$true] %s985_s23 }
  0x51   : > { %806 = vmatpush.msrb.mxu2 %v1166_v63  ;;  %826 = vmatpush.msrb.mxu3 %v1182_v1  ;;  %v1125_v63 = vld [vmem:[%s2042_s3 + $0x208] sm:$0xff]  ;;  %s1268_s25 = sshra.s32 %s986_s23, 4  ;;  %s1269_s25 = int_to_ptr.hbm [resolvable:$true] %s1268_s25 }
  0x52   : > { %713 = vmatpush.msrb.mxu0 %v1133_v2  ;;  %733 = vmatpush.msrb.mxu1 %v1149_v3  ;;  %v1141_v1 = vld [vmem:[%s2042_s3 + $0x288] sm:$0xff]  ;;  %v1863_v3 = vadd.f32 %v312_v48, %v311_v44  ;;  %s1270_s6 = scalar_lea.hbm %s1269_s25, 8  ;;  %p1275_p3 = scmp.lt.s32.totalorder %s1269_s25, %s2044_s5 }
  0x53   : > { %807 = vmatpush.msrb.mxu2 %v1165_v4  ;;  %827 = vmatpush.msrb.mxu3 %v1181_v5  ;;  %v1157_v2 = vld [vmem:[%s2042_s3 + $0x308] sm:$0xff]  ;;  %p1271_p0 = scmp.ne.s32.totalorder %s1269_s25, %s1270_s6  ;;  %p1276_p4 = scmp.lt.s32.totalorder %s1274_s8, %s1270_s6 }
  0x54   : > { %714 = vmatpush.msrb.mxu0 %v1132_v6  ;;  %734 = vmatpush.msrb.mxu1 %v1148_v7  ;;  %v1173_v7 = vld [vmem:[%s2042_s3 + $0x388] sm:$0xff] }
  0x55   : > { %808 = vmatpush.msrb.mxu2 %v1164_v8  ;;  %828 = vmatpush.msrb.mxu3 %v1180_v9  ;;  %v1124_v8 = vld [vmem:[%s2042_s3 + $0x200] sm:$0xff]  ;;  %p1272_p1 = pnand %p1271_p0, %p1389_p6  ;;  %p1277_p5 = por %p1276_p4, %p1275_p3 }
  0x56   : > { %715 = vmatpush.msrb.mxu0 %v1131_v11  ;;  %735 = vmatpush.msrb.mxu1 %v1147_v12  ;;  %v1140_v11 = vld [vmem:[%s2042_s3 + $0x280] sm:$0xff] }
  0x57   : > { %809 = vmatpush.msrb.mxu2 %v1163_v13  ;;  %829 = vmatpush.msrb.mxu3 %v1179_v19  ;;  %v1156_v12 = vld [vmem:[%s2042_s3 + $0x300] sm:$0xff]  ;;  %v314_v13 = vmax.f32 %v1863_v3, 0.0  ;;  %p1273_p2 = pneg %p1272_p1 }
  0x58   : > { %716 = vmatpush.msrb.mxu0 %v1130_v20  ;;  %736 = vmatpush.msrb.mxu1 %v1146_v21  ;;  %v1172_v20 = vld [vmem:[%s2042_s3 + $0x380] sm:$0xff] }
  0x59   : > { %810 = vmatpush.msrb.mxu2 %v1162_v24  ;;  %830 = vmatpush.msrb.mxu3 %v1178_v25  ;;  %p1278_p7 = pnand %p1277_p5, %p1273_p2 }
  0x5a   : > { %717 = vmatpush.msrb.mxu0 %v1129_v29  ;;  %737 = vmatpush.msrb.mxu1 %v1145_v30 }
  0x5b   : > { %811 = vmatpush.msrb.mxu2 %v1161_v31  ;;  %831 = vmatpush.msrb.mxu3 %v1177_v32 }
  0x5c   : > { %718 = vmatpush.msrb.mxu0 %v1128_v35  ;;  %738 = vmatpush.msrb.mxu1 %v1144_v36 }
  0x5d   : > { %812 = vmatpush.msrb.mxu2 %v1160_v39  ;;  %832 = vmatpush.msrb.mxu3 %v1176_v40 }
  0x5e   : > { %719 = vmatpush.msrb.mxu0 %v1127_v45  ;;  %739 = vmatpush.msrb.mxu1 %v1143_v46 }
  0x5f   : > { %813 = vmatpush.msrb.mxu2 %v1159_v47  ;;  %833 = vmatpush.msrb.mxu3 %v1175_v52 }
  0x60   : > { %720 = vmatpush.msrb.mxu0 %v1126_v53  ;;  %740 = vmatpush.msrb.mxu1 %v1142_v56 }
  0x61   : > { %814 = vmatpush.msrb.mxu2 %v1158_v57  ;;  %834 = vmatpush.msrb.mxu3 %v1174_v62 }
  0x62   : > { %721 = vmatpush.msrb.mxu0 %v1125_v63  ;;  %741 = vmatpush.msrb.mxu1 %v1141_v1 }
  0x63   : > { %815 = vmatpush.msrb.mxu2 %v1157_v2  ;;  %835 = vmatpush.msrb.mxu3 %v1173_v7 }
  0x64   : > { %722 = vmatpush.msrb.mxu0 %v1124_v8  ;;  %742 = vmatpush.msrb.mxu1 %v1140_v11 }
  0x65   : > { %816 = vmatpush.msrb.mxu2 %v1156_v12  ;;  %836 = vmatpush.msrb.mxu3 %v1172_v20 }
  0xa6   : > { %v1700_v0 = vpop.xlane.xlu0 %359 }
  0xa7   : > { %vm382_vm5 = vweird.f32 %v1700_v0 }
  0xa9   : > { %v1684_v59 = vpop.xlane.xlu1 %369 }
  0xaa   : > { %1242 = vrsqrt.f32 %v1684_v59  ;;  %vm402_vm2 = vweird.f32 %v1684_v59 }
  0xab   : > { %1244 = vrsqrt.f32 %v1700_v0 }
  0xae   : > { %v1772_v28 = vpop.xlane.xlu0 %364 }
  0xaf   : > { %vm392_vm11 = vweird.f32 %v1772_v28 }
  0xb0   : > { %v1735_v10 = vpop.eup %1242 }
  0xb1   : > { %v397_v14 = vmul.f32 %v1735_v10, %v1684_v59  ;;  %v1748_v15 = vpop.xlane.xlu1 %374  ;;  %v1759_v23 = vpop.eup %1244  ;;  %vm403_vm1 = vweird.f32 %v1735_v10 }
  0xb2   : > { %1246 = vrsqrt.f32 %v1748_v15  ;;  %v377_v27 = vmul.f32 %v1759_v23, %v1700_v0  ;;  %vm383_vm3 = vweird.f32 %v1759_v23  ;;  %vm404_vm4 = vmor %vm402_vm2, %vm403_vm1  ;;  %vm412_vm8 = vweird.f32 %v1748_v15 }
  0xb3   : > { %v398_v26 = vmul.f32 %v1735_v10, %v397_v14  ;;  %1248 = vrsqrt.f32 %v1772_v28  ;;  %vm384_vm6 = vmor %vm382_vm5, %vm383_vm3  ;;  %vm546_vm1 = vcmask 1044484   ;;  %vm847_vm2 = vcmask 77832  }
  0xb4   : > { %v378_v34 = vmul.f32 %v1759_v23, %v377_v27  ;;  %vm933_vm3 = vcmask 3072  }
  0xb5   : > { %v399_v33 = vmul.f32 0.5, %v398_v26 }
  0xb6   : > { %v379_v42 = vmul.f32 0.5, %v378_v34 }
  0xb7   : > { %v400_v41 = vsub.f32 1.5, %v399_v33 }
  0xb8   : > { %v1807_v43 = vpop.eup %1246  ;;  %v380_v50 = vsub.f32 1.5, %v379_v42 }
  0xb9   : > { %v401_v49 = vmul.f32 %v1735_v10, %v400_v41  ;;  %v407_v51 = vmul.f32 %v1807_v43, %v1748_v15  ;;  %v1829_v54 = vpop.eup %1248  ;;  %vm413_vm7 = vweird.f32 %v1807_v43 }
  0xba   : > { %v381_v60 = vmul.f32 %v1759_v23, %v380_v50  ;;  %v387_v59 = vmul.f32 %v1829_v54, %v1772_v28  ;;  %vm393_vm9 = vweird.f32 %v1829_v54  ;;  %vm414_vm10 = vmor %vm412_vm8, %vm413_vm7 }
  0xbb   : > { %v405_v58 = vsel %vm404_vm4, %v1735_v10, %v401_v49  ;;  %v408_v61 = vmul.f32 %v1807_v43, %v407_v51  ;;  %vm394_vm12 = vmor %vm392_vm11, %vm393_vm9 }
  0xbc   : > { %v418_v0 = vmul.f32 1.6, %v405_v58  ;;  %v385_v4 = vsel %vm384_vm6, %v1759_v23, %v381_v60  ;;  %v388_v6 = vmul.f32 %v1829_v54, %v387_v59 }
  0xbd   : > { %v409_v5 = vmul.f32 0.5, %v408_v61  ;;  %v416_v10 = vmul.f32 1.6, %v385_v4 }
  0xbe   : > { %v435_v9 = vperm.slane %v418_v0, %v1831_v55  ;;  %v389_v19 = vmul.f32 0.5, %v388_v6 }
  0xbf   : > { %v410_v14 = vsub.f32 1.5, %v409_v5  ;;  %v427_v23 = vperm.slane %v416_v10, %v1831_v55 }
  0xc0   : > { %v1886_v21 = vmul.f32 %v1438_v16, %v435_v9  ;;  %v390_v25 = vsub.f32 1.5, %v389_v19  ;;  %v1899_v16 = vmin.f32 %v314_v13, 1.0 }
  0xc1   : > { %v411_v24 = vmul.f32 %v1807_v43, %v410_v14  ;;  %v1895_v27 = vmul.f32 %v1440_v17, %v427_v23 }
  0xc2   : > { %v450_v26 = vadd.f32 %v1886_v21, %v1863_v3  ;;  %v391_v15 = vmul.f32 %v1829_v54, %v390_v25  ;;  %v530_v36 = vperm.slane %v1899_v16, 1  ;;  %v531_v37 = vperm.slane %v1899_v16, 5 }
  0xc3   : > { %v415_v29 = vsel %vm414_vm10, %v1807_v43, %v411_v24  ;;  %v448_v30 = vadd.f32 %v1895_v27, %v1863_v3  ;;  %v594_v40 = vperm.slane %v1899_v16, 0  ;;  %v595_v42 = vperm.slane %v1899_v16, 4 }
  0xc4   : > { %v419_v31 = vmul.f32 1.6, %v415_v29  ;;  %v454_v32 = vmax.f32 %v450_v26, 0.0  ;;  %v395_v17 = vsel %vm394_vm12, %v1829_v54, %v391_v15  ;;  %v687_v43 = vperm.slane %v1899_v16, 2 }
  0xc5   : > { %v452_v33 = vmax.f32 %v448_v30, 0.0  ;;  %v417_v35 = vmul.f32 1.6, %v395_v17  ;;  %v781_v46 = vperm.slane %v1899_v16, 3  ;;  %v782_v49 = vperm.slane %v1899_v16, 7 }
  0xc6   : > { %v439_v34 = vperm.slane %v419_v31, %v1831_v55  ;;  %v1917_v41 = vmin.f32 %v454_v32, 1.0 }
  0xc7   : > { %v1910_v38 = vmin.f32 %v452_v33, 1.0  ;;  %v431_v39 = vperm.slane %v417_v35, %v1831_v55 }
  0xc8   : > { %v1913_v28 = vmul.f32 %v1442_v18, %v439_v34  ;;  %v688_v18 = vperm.slane %v1899_v16, 6  ;;  %v536_v53 = vperm.slane %v1917_v41, 1  ;;  %v537_v54 = vperm.slane %v1917_v41, 5 }
  0xc9   : > { %v1924_v45 = vmul.f32 %v1450_v22, %v431_v39  ;;  %v532_v47 = vperm.slane %v1910_v38, 1  ;;  %v533_v48 = vperm.slane %v1910_v38, 5  ;;  %v596_v52 = vperm.slane %v1910_v38, 0 }
  0xca   : > { %v451_v44 = vadd.f32 %v1913_v28, %v1863_v3  ;;  %v597_v22 = vperm.slane %v1910_v38, 4  ;;  %v600_v57 = vperm.slane %v1917_v41, 0  ;;  %v601_v58 = vperm.slane %v1917_v41, 4 }
  0xcb   : > { %v449_v51 = vadd.f32 %v1924_v45, %v1863_v3  ;;  %v541_v60 = vsel %vm540_vm13, %v532_v47, %v530_v36  ;;  %v548_v61 = vsel %vm540_vm13, %v533_v48, %v531_v37  ;;  %v689_v59 = vperm.slane %v1910_v38, 2 }
  0xcc   : > { %v455_v50 = vmax.f32 %v451_v44, 0.0  ;;  %v690_v62 = vperm.slane %v1910_v38, 6  ;;  %v604_v0 = vsel %vm540_vm13, %v596_v52, %v594_v40  ;;  %v608_v1 = vsel %vm540_vm13, %v597_v22, %v595_v42 }
  0xcd   : > { %v453_v56 = vmax.f32 %v449_v51, 0.0  ;;  %v783_v2 = vperm.slane %v1910_v38, 3  ;;  %v784_v6 = vperm.slane %v1910_v38, 7  ;;  %v697_v17 = vsel %vm540_vm13, %v689_v59, %v687_v43 }
  0xce   : > { %v1937_v55 = vmin.f32 %v455_v50, 1.0  ;;  %v701_v33 = vsel %vm540_vm13, %v690_v62, %v688_v18  ;;  %v693_v38 = vperm.slane %v1917_v41, 2  ;;  %v694_v39 = vperm.slane %v1917_v41, 6 }
  0xcf   : > { %v457_v63 = vmin.f32 %v453_v56, 1.0  ;;  %v791_v37 = vsel %vm540_vm13, %v783_v2, %v781_v46  ;;  %v795_v42 = vsel %vm540_vm13, %v784_v6, %v782_v49  ;;  %v787_v43 = vperm.slane %v1917_v41, 3  ;;  %v1241_v6 = vld [vmem:[%s2043_s4] ss:$0 sm:$0xff] }
  0xd0   : > { %v538_v3 = vperm.slane %v1937_v55, 1  ;;  %v539_v4 = vperm.slane %v1937_v55, 5  ;;  %v602_v5 = vperm.slane %v1937_v55, 0  ;;  %v603_v11 = vperm.slane %v1937_v55, 4 }
  0xd1   : > { %v534_v7 = vperm.slane %v457_v63, 1  ;;  %v535_v8 = vperm.slane %v457_v63, 5  ;;  %v598_v9 = vperm.slane %v457_v63, 0  ;;  %v599_v10 = vperm.slane %v457_v63, 4 }
  0xd2   : > { %v691_v12 = vperm.slane %v457_v63, 2  ;;  %v692_v13 = vperm.slane %v457_v63, 6  ;;  %v785_v14 = vperm.slane %v457_v63, 3  ;;  %v786_v34 = vperm.slane %v457_v63, 7 }
  0xd3   : > { %v543_v19 = vsel %vm542_vm14, %v534_v7, %v541_v60  ;;  %v549_v20 = vsel %vm542_vm14, %v535_v8, %v548_v61  ;;  %v605_v23 = vsel %vm542_vm14, %v598_v9, %v604_v0  ;;  %v609_v24 = vsel %vm542_vm14, %v599_v10, %v608_v1 }
  0xd4   : > { %v545_v25 = vsel %vm544_vm15, %v536_v53, %v543_v19  ;;  %v550_v26 = vsel %vm544_vm15, %v537_v54, %v549_v20  ;;  %v606_v16 = vsel %vm544_vm15, %v600_v57, %v605_v23  ;;  %v610_v29 = vsel %vm544_vm15, %v601_v58, %v609_v24 }
  0xd5   : > { %v547_v15 = vsel %vm546_vm1, %v538_v3, %v545_v25  ;;  %v551_v30 = vsel %vm546_vm1, %v539_v4, %v550_v26  ;;  %v607_v31 = vsel %vm546_vm1, %v602_v5, %v606_v16  ;;  %v611_v32 = vsel %vm546_vm1, %v603_v11, %v610_v29 }
  0xd6   : > { %570 = vmatmul.f32.vlgmr.msra.gmra.mxu0 %v547_v15  ;;  %590 = vmatmul.f32.vlgmr.msra.gmra.mxu1 %v551_v30  ;;  %v698_v35 = vsel %vm542_vm14, %v691_v12, %v697_v17  ;;  %v702_v36 = vsel %vm542_vm14, %v692_v13, %v701_v33  ;;  %v792_v40 = vsel %vm542_vm14, %v785_v14, %v791_v37  ;;  %v788_v44 = vperm.slane %v1917_v41, 7 }
  0xd7   : > { %630 = vmatmul.f32.vlgmr.msra.gmra.mxu2 %v607_v31  ;;  %650 = vmatmul.f32.vlgmr.msra.gmra.mxu3 %v611_v32  ;;  %v796_v18 = vsel %vm542_vm14, %v786_v34, %v795_v42  ;;  %v699_v47 = vsel %vm544_vm15, %v693_v38, %v698_v35  ;;  %v703_v48 = vsel %vm544_vm15, %v694_v39, %v702_v36  ;;  %v695_v46 = vperm.slane %v1937_v55, 2 }
  0xd8   : > { %v696_v50 = vperm.slane %v1937_v55, 6  ;;  %v793_v51 = vsel %vm544_vm15, %v787_v43, %v792_v40  ;;  %v797_v52 = vsel %vm544_vm15, %v788_v44, %v796_v18  ;;  %v789_v49 = vperm.slane %v1937_v55, 3 }
  0xd9   : > { %v790_v22 = vperm.slane %v1937_v55, 7  ;;  %v700_v41 = vsel %vm546_vm1, %v695_v46, %v699_v47  ;;  %v1319_v10 = vmov 0  }
  0xda   : > { %v704_v53 = vsel %vm546_vm1, %v696_v50, %v703_v48  ;;  %v794_v54 = vsel %vm546_vm1, %v789_v49, %v793_v51  ;;  %1240 = vset.pattern.permute.xlu1 %v1319_v10  ;;  %1239 = vset.pattern.permute.xlu0 %v1319_v10 }
  0xdb   : > { %v798_v56 = vsel %vm546_vm1, %v790_v22, %v797_v52  ;;  %1238 = vset.pattern.permute.xlu2 %v1319_v10 }
  0xde   : > { %723 = vmatmul.f32.vlgmr.msrb.gmra.mxu0 %v700_v41  ;;  %743 = vmatmul.f32.vlgmr.msrb.gmra.mxu1 %v704_v53 }
  0xdf   : > { %817 = vmatmul.f32.vlgmr.msrb.gmra.mxu2 %v794_v54  ;;  %837 = vmatmul.f32.vlgmr.msrb.gmra.mxu3 %v798_v56 }
 0x153   : > { %v571_v57 = vpop.f32.mrf.mxu0  ;;  %v591_v58 = vpop.f32.mrf.mxu1 }
 0x154   : > { %v592_v60 = vadd.f32 %v591_v58, %v571_v57 }
 0x15a   : > { %v631_v61 = vpop.f32.mrf.mxu2  ;;  %v651_v59 = vpop.f32.mrf.mxu3 }
 0x15b   : > { %v632_v62 = vadd.f32 %v631_v61, %v592_v60  ;;  %v724_v63 = vpop.f32.mrf.mxu0  ;;  %v744_v55 = vpop.f32.mrf.mxu1 }
 0x15c   : > { %v745_v1 = vadd.f32 %v744_v55, %v724_v63 }
 0x15d   : > { %v652_v0 = vadd.f32 %v651_v59, %v632_v62 }
 0x15f   : > { %v747_v4 = vadd.f32 %v745_v1, %v652_v0 }
 0x162   : > { %v818_v2 = vpop.f32.mrf.mxu2  ;;  %v838_v3 = vpop.f32.mrf.mxu3 }
 0x163   : > { %v839_v5 = vadd.f32 %v838_v3, %v818_v2 }
 0x165   : > { %v841_v7 = vadd.f32 %v839_v5, %v747_v4 }
 0x167   : > { %v846_v8 = vadd.f32 %v1241_v6, %v841_v7 }
 0x169   : > { %v848_v9 = vsel %vm847_vm2, %v846_v8, -inf }
 0x16a   : > { %849 = vmax.xlane.f32.xlu2 %v848_v9 }
 0x1dd   : > { %v850_v11 = vpop.xlane.xlu2 %849 }
 0x1de   : > { %v851_v12 = vsub.f32 %v846_v8, %v850_v11 }
 0x1e0   : > { %v852_v13 = vperm.slane %v851_v12, 0 }
 0x1e2   : > { %v853_v14 = vsub.f32 %v852_v13, %v851_v12 }
 0x1e4   : > { %855 = vst [vmem:[#allocation1] sm:$0xff] %v853_v14  ;;  %v929_v19 = vmul.f32 %v853_v14, %v853_v14 }
 0x1e6   : > { %v931_v20 = vrot.slane %v929_v19, 1 }
 0x1e8   : > { %v934_v23 = vsel %vm933_vm3, %v931_v20, 0.0 }
 0x1e9   : > { %v935_v24 = vrot.slane %v934_v23, 4 }
 0x1eb   : > { %v936_v25 = vadd.f32 %v935_v24, %v934_v23  ;;  %v861_v26 = vld [vmem:[#allocation1 + $0x3] ss:$9 sm:$0xff]  ;;  %v857_v29 = vld [vmem:[#allocation1 + $0x1] ss:$9 sm:$0xff] }
 0x1ec   : > { %v859_v16 = vld [vmem:[#allocation1 + $0x2] ss:$9 sm:$0xff]  ;;  %v866_v15 = vperm.slane %v861_v26, 0  ;;  %v864_v31 = vperm.slane %v857_v29, 0  ;;  %v863_v34 = vld [vmem:[#allocation1 + $0x4] ss:$9 sm:$0xff] }
 0x1ed   : > { %v865_v30 = vperm.slane %v859_v16, 0  ;;  %v937_v32 = vrot.slane %v936_v25, 2  ;;  %v867_v36 = vperm.slane %v863_v34, 0 }
 0x1ee   : > { %877 = vperm.xlu1 %1240, %v866_v15   ;;  %869 = vperm.xlu2 %1238, %v864_v31  }
 0x1ef   : > { %873 = vperm.xlu0 %1239, %v865_v30   ;;  %v938_v17 = vadd.f32 %v937_v32, %v936_v25 }
 0x1f1   : > { %v939_v33 = vrot.slane %v938_v17, 1 }
 0x1f3   : > { %v940_v35 = vadd.f32 %v939_v33, %v938_v17 }
 0x1f5   : > { %1250 = vrsqrt.f32 %v940_v35  ;;  %vm948_vm4 = vcmp.eq.f32.partialorder %v940_v35, inf  ;;  %v951_v18 = vand.u32 2147483648, %v940_v35  ;;  %vm950_vm5 = vcmp.eq.f32.partialorder %v940_v35, 0.0 }
 0x1f6   : > { %881 = vperm.xlu2 %1238, %v867_v36  }
 0x1fb   : > { %v1251_v37 = vpop.eup %1250 }
 0x1fc   : > { %v942_v38 = vmul.f32 %v1251_v37, %v940_v35 }
 0x1fe   : > { %v943_v39 = vmul.f32 %v1251_v37, %v942_v38 }
 0x200   : > { %v944_v40 = vmul.f32 0.5, %v943_v39 }
 0x202   : > { %v945_v42 = vsub.f32 1.5, %v944_v40 }
 0x204   : > { %v946_v43 = vmul.f32 %v1251_v37, %v945_v42 }
 0x206   : > { %v947_v44 = vmul.f32 %v946_v43, %v940_v35 }
 0x208   : > { %v949_v47 = vsel %vm948_vm4, %v940_v35, %v947_v44 }
 0x209   : > { %v952_v48 = vsel %vm950_vm5, %v951_v18, %v949_v47 }
 0x20a   : > { %v953_v46 = vadd.f32 1e-20, %v952_v48 }
 0x20c   : > { %1252 = vrcp.f32 %v953_v46 }
 0x212   : > { %v1253_v50 = vpop.eup %1252 }
 0x213   : > { %v955_v51 = vmul.f32 10.0, %v1253_v50 }
 0x215   : > { %958 = vperm.xlu2 %1238, %v955_v51  }
 0x248   : > { %v870_v52 = vpop.permute.xlu2 %869 }
 0x249   : > { %v884_v49 = vmul.f32 %v870_v52, %v1895_v27 }
 0x24b   : > { %892 = vst [vmem:[#allocation1] ss:$2 sm:$0xff] %v884_v49 }
 0x250   : > { %v882_v22 = vpop.permute.xlu2 %881 }
 0x251   : > { %v887_v41 = vmul.f32 %v882_v22, %v1913_v28 }
 0x252   : > { %v893_v58 = vld.sshfl [vmem:[#allocation1] sm:$0xff pattern:$0x75316420]  ;;  %v894_v60 = vld.sshfl [vmem:[#allocation1 + $0x8] sm:$0xff pattern:$0x75316420] }
 0x253   : > { %904 = vst [vmem:[#allocation1 + $0x30] ss:$2 sm:$0xff] %v887_v41  ;;  %v915_v63 = vsel %vm355_vm0, %v893_v58, 0.0  ;;  %v922_v55 = vsel %vm355_vm0, %v894_v60, 0.0 }
 0x260   : > { %v878_v53 = vpop.permute.xlu1 %877 }
 0x261   : > { %v874_v54 = vpop.permute.xlu0 %873  ;;  %v886_v56 = vmul.f32 %v878_v53, %v1886_v21  ;;  %v905_v21 = vld.sshfl [vmem:[#allocation1 + $0x30] sm:$0xff pattern:$0x75316420] }
 0x262   : > { %v885_v57 = vmul.f32 %v874_v54, %v1924_v45  ;;  %v906_v45 = vld.sshfl [vmem:[#allocation1 + $0x38] sm:$0xff pattern:$0x75316420]  ;;  %v920_v7 = vsel %vm355_vm0, %v905_v21, 0.0 }
 0x263   : > { %900 = vst [vmem:[#allocation1 + $0x20] ss:$2 sm:$0xff] %v886_v56  ;;  %v927_v8 = vsel %vm355_vm0, %v906_v45, 0.0 }
 0x264   : > { %896 = vst [vmem:[#allocation1 + $0x10] ss:$2 sm:$0xff] %v885_v57 }
 0x26a   : > { %v901_v61 = vld.sshfl [vmem:[#allocation1 + $0x20] sm:$0xff pattern:$0x75316420]  ;;  %v902_v59 = vld.sshfl [vmem:[#allocation1 + $0x28] sm:$0xff pattern:$0x75316420] }
 0x26b   : > { %v897_v27 = vld.sshfl [vmem:[#allocation1 + $0x10] sm:$0xff pattern:$0x75316420]  ;;  %v898_v62 = vld.sshfl [vmem:[#allocation1 + $0x18] sm:$0xff pattern:$0x75316420] }
 0x26c   : > { %v916_v28 = vsel %vm355_vm0, %v897_v27, 0.0  ;;  %v923_v0 = vsel %vm355_vm0, %v898_v62, 0.0  ;;  %v918_v3 = vsel %vm355_vm0, %v901_v61, 0.0  ;;  %v925_v4 = vsel %vm355_vm0, %v902_v59, 0.0 }
 0x26d   : > { %v917_v1 = vadd.f32 %v916_v28, %v915_v63  ;;  %v924_v2 = vadd.f32 %v923_v0, %v922_v55 }
 0x26f   : > { %v919_v5 = vadd.f32 %v918_v3, %v917_v1  ;;  %v926_v6 = vadd.f32 %v925_v4, %v924_v2  ;;  %v959_v11 = vpop.permute.xlu2 %958 }
 0x271   : > { %v921_v9 = vadd.f32 %v920_v7, %v919_v5  ;;  %v928_v10 = vadd.f32 %v927_v8, %v926_v6 }
 0x273   : > { %v962_v12 = vmul.f32 %v959_v11, %v928_v10  ;;  %v961_v13 = vmul.f32 %v959_v11, %v921_v9 }
 0x275   : > { %v965_v14 = vrot.slane %v962_v12, 4 }
 0x277   : > { %v966_v19 = vsel %vm355_vm0, %v961_v13, %v965_v14 }
 0x278   : > { %968 = vst [vmem:[%s300_s22] sm:$0xff] %v966_v19 }
 0x279   : > { %1281 = shalt.err (!%p1278_p7)
}
 0x27a   : > { %1197 = dma.vmem_to_hbm [thread:$0]  (%p1389_p6), %s984_s17, 128, %s986_s23, %s970_s30  }
 0x27b PF: > { %s997_s12 = sand.u32 1, %s1304_s18   ;;  %p1200_p10 = pnand %p1077_p9, %p1393_p8 }
 0x27c   : > { %s998_s14 = scalar_lea.sflag [#allocation4], %s997_s12 }
 0x27d   : > { %p1201_p11 = pneg %p1200_p10 }
 0x27f   : > { %1299 = dma.done.wait (%p1201_p11), %s998_s14, 128  }
 0x280   : > { %1301 = vsyncadd (%p1201_p11), %s998_s14, 4294967168  ;;  %p15_p12 = scmp.ge.s32.totalorder %s1375_s24, 4   ;;  %s2047_s18 = smov %s1308_s19 }
 0x281   : > { %s2048_s19 = smov %s1312_s20  ;;  %s2049_s20 = smov %s1387_s27 }
 0x282   : > { %s2050_s21 = smov %s1375_s24  ;;  %17 = sbr.rel (!%p15_p12) target bundleno = 3 (0x3), region = 137 }
 0x287   :  { %1004 = vsyncpa [#allocation4], 1 }
 0x288   :  { %1006 = vsyncpa [#allocation4 + $0x1], 1 }

</bundles_post_ra>
